<compile_context>
chip_gen: v6e
topology: v6e:2x2x1
jax: 0.10.0
libtpu: 0.0.40
codegen_flags: <defaults>
</compile_context>

<pallas_src>
import functools

import jax
import jax.numpy as jnp
from jax.experimental import pallas as pl
from jax.experimental.pallas import tpu as pltpu


def lstm_forecast_kernel(x_ref, wih_ref, whh_ref, b_ref, wlin_ref, blin_ref,
                         out_ref, xg_ref, h_ref, *, batch, seq_len, hidden):
    """Full-sequence LSTM + deferred linear head, single kernel invocation.

    x_ref    : (T*B, F)   time-major-flat input, row index = t*B + b
    wih_ref  : (F, 4H)    transposed torch weight_ih_l0
    whh_ref  : (H, 4H)    transposed torch weight_hh_l0
    b_ref    : (1, 4H)    bias_ih + bias_hh
    wlin_ref : (H, F)     transposed torch linear.weight
    blin_ref : (1, F)     torch linear.bias
    out_ref  : (T*B, F)   time-major-flat output
    xg_ref   : (T*B, 4H)  VMEM scratch: precomputed input-gate contributions
    h_ref    : (T, B, H)  VMEM scratch: hidden-state history
    """
    B, T, H = batch, seq_len, hidden

    # ---- Stage 1: hoist the input projection off the recurrent path -------
    # One MXU call for the entire sequence instead of one per timestep.
    xg_ref[...] = (
        jnp.dot(x_ref[...], wih_ref[...], preferred_element_type=jnp.float32)
        + b_ref[...])

    # ---- Stage 2: sequential recurrence (only h @ W_hh^T per step) --------
    whh = whh_ref[...]                       # (H, 4H), kept resident in vregs

    def step(t, carry):
        h_prev, c_prev = carry
        # Rows [t*B, t*B + B) of xg_ref hold x_t @ W_ih^T + bias for all b.
        gates = xg_ref[pl.ds(t * B, B), :] + jnp.dot(
            h_prev, whh, preferred_element_type=jnp.float32)     # (B, 4H)
        # PyTorch LSTM gate order: i, f, g, o
        i = jax.nn.sigmoid(gates[:, 0:H])
        f = jax.nn.sigmoid(gates[:, H:2 * H])
        g = jnp.tanh(gates[:, 2 * H:3 * H])
        o = jax.nn.sigmoid(gates[:, 3 * H:4 * H])
        c_new = f * c_prev + i * g
        h_new = o * jnp.tanh(c_new)
        h_ref[t] = h_new                     # leading-dim store of (B, H)
        return h_new, c_new

    h0 = jnp.zeros((B, H), jnp.float32)      # PyTorch default: zero init state
    c0 = jnp.zeros((B, H), jnp.float32)
    jax.lax.fori_loop(0, T, step, (h0, c0), unroll=(T <= 64))

    # ---- Stage 3: deferred linear head, one matmul for the whole sequence -
    h_all = h_ref[...].reshape(T * B, H)
    out_ref[...] = (
        jnp.dot(h_all, wlin_ref[...], preferred_element_type=jnp.float32)
        + blin_ref[...])


@jax.jit
def forecast_net_forward(x, params):
    """x: (B, T, F) float32 -> (B, T, F) float32 (batch_first, like PyTorch)."""
    B, T, F = x.shape
    H = params["w_hh"].shape[1]

    # Time-major-flat layout (row = t*B + b); small copy, fused under jit.
    x_tm = jnp.transpose(x, (1, 0, 2)).reshape(T * B, F)
    wih_t = params["w_ih"].T                              # (F, 4H)
    whh_t = params["w_hh"].T                              # (H, 4H)
    bias = (params["b_ih"] + params["b_hh"]).reshape(1, 4 * H)
    wlin_t = params["w_lin"].T                            # (H, F)
    blin = params["b_lin"].reshape(1, F)

    out_tm = pl.pallas_call(
        functools.partial(lstm_forecast_kernel, batch=B, seq_len=T, hidden=H),
        out_shape=jax.ShapeDtypeStruct((T * B, F), jnp.float32),
        scratch_shapes=[
            pltpu.VMEM((T * B, 4 * H), jnp.float32),   # x-projection history
            pltpu.VMEM((T, B, H), jnp.float32),        # hidden-state history
        ],
    )(x_tm, wih_t, whh_t, bias, wlin_t, blin)

    return jnp.transpose(out_tm.reshape(T, B, F), (1, 0, 2))   # (B, T, F)


def forecast_net_ref(x, params):
    """Pure-JAX reference (mirrors torch.nn.LSTM + nn.Linear forward)."""
    B, T, F = x.shape
    H = params["w_hh"].shape[1]
    wih, whh = params["w_ih"], params["w_hh"]
    b = params["b_ih"] + params["b_hh"]

    def step(carry, x_t):
        h, c = carry
        gates = x_t @ wih.T + h @ whh.T + b
        i = jax.nn.sigmoid(gates[:, :H])
        f = jax.nn.sigmoid(gates[:, H:2 * H])
        g = jnp.tanh(gates[:, 2 * H:3 * H])
        o = jax.nn.sigmoid(gates[:, 3 * H:])
        c = f * c + i * g
        h = o * jnp.tanh(c)
        return (h, c), h

    h0 = jnp.zeros((B, H), jnp.float32)
    c0 = jnp.zeros((B, H), jnp.float32)
    _, hs = jax.lax.scan(step, (h0, c0), jnp.transpose(x, (1, 0, 2)))
    out = hs @ params["w_lin"].T + params["b_lin"]        # (T, B, F)
    return jnp.transpose(out, (1, 0, 2))


def init_params(key, in_features, hidden_size):
    """Deterministic init matching PyTorch parameter shapes."""
    H, F = hidden_size, in_features
    k_lstm = 1.0 / jnp.sqrt(H)
    k_lin = 1.0 / jnp.sqrt(H)
    ks = jax.random.split(key, 6)
    u = lambda k, shape, scale: jax.random.uniform(
        k, shape, jnp.float32, -scale, scale)
    return {
        "w_ih": u(ks[0], (4 * H, F), k_lstm),   # torch weight_ih_l0
        "w_hh": u(ks[1], (4 * H, H), k_lstm),   # torch weight_hh_l0
        "b_ih": u(ks[2], (4 * H,), k_lstm),     # torch bias_ih_l0
        "b_hh": u(ks[3], (4 * H,), k_lstm),     # torch bias_hh_l0
        "w_lin": u(ks[4], (F, H), k_lin),       # torch linear.weight
        "b_lin": u(ks[5], (F,), k_lin),         # torch linear.bias
    }


if __name__ == "__main__":
    B, T = 2, 8
    in_features, hidden_size = 4, 32

    key = jax.random.PRNGKey(0)
    k_x, k_p = jax.random.split(key)
    x = jax.random.normal(k_x, (B, T, in_features), jnp.float32)
    params = init_params(k_p, in_features, hidden_size)

    out = jax.block_until_ready(forecast_net_forward(x, params))
    ref = forecast_net_ref(x, params)

    assert out.shape == (B, T, in_features)
    assert jnp.allclose(out, ref, atol=1e-3, rtol=1e-3), "mismatch vs reference"

    print("KERNEL_OK")
</pallas_src>

<mosaic_0001>
module attributes {stable_mosaic.version = 11 : i64} {
  func.func @lstm_forecast_kernel(%arg0: memref<16x4xf32, #tpu.memory_space<vmem>>, %arg1: memref<4x128xf32, #tpu.memory_space<vmem>>, %arg2: memref<32x128xf32, #tpu.memory_space<vmem>>, %arg3: memref<1x128xf32, #tpu.memory_space<vmem>>, %arg4: memref<32x4xf32, #tpu.memory_space<vmem>>, %arg5: memref<1x4xf32, #tpu.memory_space<vmem>>, %arg6: memref<16x4xf32, #tpu.memory_space<vmem>>, %arg7: memref<16x128xf32, #tpu.memory_space<vmem>>, %arg8: memref<8x2x32xf32, #tpu.memory_space<vmem>>) attributes {dimension_semantics = [], scalar_prefetch = 0 : i64, scratch_operands = 2 : i64, tpu.core_type = #tpu.core_type<tc>} {
    %c0 = arith.constant 0 : index
    %c0_0 = arith.constant 0 : index
    %0 = vector.load %arg0[%c0, %c0_0] : memref<16x4xf32, #tpu.memory_space<vmem>>, vector<16x4xf32>
    %c0_1 = arith.constant 0 : index
    %c0_2 = arith.constant 0 : index
    %1 = vector.load %arg1[%c0_1, %c0_2] : memref<4x128xf32, #tpu.memory_space<vmem>>, vector<4x128xf32>
    %cst = arith.constant dense<0.000000e+00> : vector<16x128xf32>
    %2 = tpu.matmul %0, %1, %cst {dimension_numbers = #tpu.dot_dimension_numbers<[1], [0], [0], [1], [0, 0, 1, 1], [], []>} : vector<16x4xf32>, vector<4x128xf32>, vector<16x128xf32> -> vector<16x128xf32>
    %c0_3 = arith.constant 0 : index
    %c0_4 = arith.constant 0 : index
    %3 = vector.load %arg3[%c0_3, %c0_4] : memref<1x128xf32, #tpu.memory_space<vmem>>, vector<1x128xf32>
    %4 = vector.broadcast %3 : vector<1x128xf32> to vector<16x128xf32>
    %5 = arith.addf %2, %4 : vector<16x128xf32>
    %c0_5 = arith.constant 0 : index
    %c0_6 = arith.constant 0 : index
    %6 = vector.load %arg7[%c0_5, %c0_6] : memref<16x128xf32, #tpu.memory_space<vmem>>, vector<16x128xf32>
    tpu.vector_store %arg7[%c0_5, %c0_6], %5 {strides = array<i32>} : memref<16x128xf32, #tpu.memory_space<vmem>>, vector<16x128xf32>,
    %c0_7 = arith.constant 0 : index
    %c0_8 = arith.constant 0 : index
    %7 = vector.load %arg2[%c0_7, %c0_8] : memref<32x128xf32, #tpu.memory_space<vmem>>, vector<32x128xf32>
    %cst_9 = arith.constant 0.000000e+00 : f32
    %8 = vector.broadcast %cst_9 : f32 to vector<2x32xf32>
    %cst_10 = arith.constant 0.000000e+00 : f32
    %9 = vector.broadcast %cst_10 : f32 to vector<2x32xf32>
    %c0_i32 = arith.constant 0 : i32
    %c2_i32 = arith.constant 2 : i32
    %10 = arith.muli %c0_i32, %c2_i32 : i32
    %11 = arith.index_cast %10 : i32 to index
    %c0_11 = arith.constant 0 : index
    %12 = vector.load %arg7[%11, %c0_11] : memref<16x128xf32, #tpu.memory_space<vmem>>, vector<2x128xf32>
    %cst_12 = arith.constant dense<0.000000e+00> : vector<2x128xf32>
    %13 = tpu.matmul %8, %7, %cst_12 {dimension_numbers = #tpu.dot_dimension_numbers<[1], [0], [0], [1], [0, 0, 1, 1], [], []>} : vector<2x32xf32>, vector<32x128xf32>, vector<2x128xf32> -> vector<2x128xf32>
    %14 = arith.addf %12, %13 : vector<2x128xf32>
    %15 = vector.extract_strided_slice %14 {offsets = [0, 0], sizes = [2, 32], strides = [1, 1]} : vector<2x128xf32> to vector<2x32xf32>
    %16 = arith.negf %15 : vector<2x32xf32>
    %17 = math.exp %16 : vector<2x32xf32>
    %cst_13 = arith.constant 1.000000e+00 : f32
    %18 = vector.broadcast %cst_13 : f32 to vector<2x32xf32>
    %19 = arith.addf %18, %17 : vector<2x32xf32>
    %20 = arith.divf %18, %19 : vector<2x32xf32>
    %21 = vector.extract_strided_slice %14 {offsets = [0, 32], sizes = [2, 32], strides = [1, 1]} : vector<2x128xf32> to vector<2x32xf32>
    %22 = arith.negf %21 : vector<2x32xf32>
    %23 = math.exp %22 : vector<2x32xf32>
    %cst_14 = arith.constant 1.000000e+00 : f32
    %24 = vector.broadcast %cst_14 : f32 to vector<2x32xf32>
    %25 = arith.addf %24, %23 : vector<2x32xf32>
    %26 = arith.divf %24, %25 : vector<2x32xf32>
    %27 = vector.extract_strided_slice %14 {offsets = [0, 64], sizes = [2, 32], strides = [1, 1]} : vector<2x128xf32> to vector<2x32xf32>
    %28 = math.tanh %27 : vector<2x32xf32>
    %29 = vector.extract_strided_slice %14 {offsets = [0, 96], sizes = [2, 32], strides = [1, 1]} : vector<2x128xf32> to vector<2x32xf32>
    %30 = arith.negf %29 : vector<2x32xf32>
    %31 = math.exp %30 : vector<2x32xf32>
    %cst_15 = arith.constant 1.000000e+00 : f32
    %32 = vector.broadcast %cst_15 : f32 to vector<2x32xf32>
    %33 = arith.addf %32, %31 : vector<2x32xf32>
    %34 = arith.divf %32, %33 : vector<2x32xf32>
    %35 = arith.mulf %26, %9 : vector<2x32xf32>
    %36 = arith.mulf %20, %28 : vector<2x32xf32>
    %37 = arith.addf %35, %36 : vector<2x32xf32>
    %38 = math.tanh %37 : vector<2x32xf32>
    %39 = arith.mulf %34, %38 : vector<2x32xf32>
    %40 = arith.index_cast %c0_i32 : i32 to index
    %c0_16 = arith.constant 0 : index
    %c0_17 = arith.constant 0 : index
    %41 = vector.load %arg8[%40, %c0_16, %c0_17] : memref<8x2x32xf32, #tpu.memory_space<vmem>>, vector<1x2x32xf32>
    %42 = vector.shape_cast %41 : vector<1x2x32xf32> to vector<2x32xf32>
    %43 = vector.shape_cast %39 : vector<2x32xf32> to vector<1x2x32xf32>
    tpu.vector_store %arg8[%40, %c0_16, %c0_17], %43 {strides = array<i32>} : memref<8x2x32xf32, #tpu.memory_space<vmem>>, vector<1x2x32xf32>,
    %c1_i32 = arith.constant 1 : i32
    %c2_i32_18 = arith.constant 2 : i32
    %44 = arith.muli %c1_i32, %c2_i32_18 : i32
    %45 = arith.index_cast %44 : i32 to index
    %c0_19 = arith.constant 0 : index
    %46 = vector.load %arg7[%45, %c0_19] : memref<16x128xf32, #tpu.memory_space<vmem>>, vector<2x128xf32>
    %cst_20 = arith.constant dense<0.000000e+00> : vector<2x128xf32>
    %47 = tpu.matmul %39, %7, %cst_20 {dimension_numbers = #tpu.dot_dimension_numbers<[1], [0], [0], [1], [0, 0, 1, 1], [], []>} : vector<2x32xf32>, vector<32x128xf32>, vector<2x128xf32> -> vector<2x128xf32>
    %48 = arith.addf %46, %47 : vector<2x128xf32>
    %49 = vector.extract_strided_slice %48 {offsets = [0, 0], sizes = [2, 32], strides = [1, 1]} : vector<2x128xf32> to vector<2x32xf32>
    %50 = arith.negf %49 : vector<2x32xf32>
    %51 = math.exp %50 : vector<2x32xf32>
    %cst_21 = arith.constant 1.000000e+00 : f32
    %52 = vector.broadcast %cst_21 : f32 to vector<2x32xf32>
    %53 = arith.addf %52, %51 : vector<2x32xf32>
    %54 = arith.divf %52, %53 : vector<2x32xf32>
    %55 = vector.extract_strided_slice %48 {offsets = [0, 32], sizes = [2, 32], strides = [1, 1]} : vector<2x128xf32> to vector<2x32xf32>
    %56 = arith.negf %55 : vector<2x32xf32>
    %57 = math.exp %56 : vector<2x32xf32>
    %cst_22 = arith.constant 1.000000e+00 : f32
    %58 = vector.broadcast %cst_22 : f32 to vector<2x32xf32>
    %59 = arith.addf %58, %57 : vector<2x32xf32>
    %60 = arith.divf %58, %59 : vector<2x32xf32>
    %61 = vector.extract_strided_slice %48 {offsets = [0, 64], sizes = [2, 32], strides = [1, 1]} : vector<2x128xf32> to vector<2x32xf32>
    %62 = math.tanh %61 : vector<2x32xf32>
    %63 = vector.extract_strided_slice %48 {offsets = [0, 96], sizes = [2, 32], strides = [1, 1]} : vector<2x128xf32> to vector<2x32xf32>
    %64 = arith.negf %63 : vector<2x32xf32>
    %65 = math.exp %64 : vector<2x32xf32>
    %cst_23 = arith.constant 1.000000e+00 : f32
    %66 = vector.broadcast %cst_23 : f32 to vector<2x32xf32>
    %67 = arith.addf %66, %65 : vector<2x32xf32>
    %68 = arith.divf %66, %67 : vector<2x32xf32>
    %69 = arith.mulf %60, %37 : vector<2x32xf32>
    %70 = arith.mulf %54, %62 : vector<2x32xf32>
    %71 = arith.addf %69, %70 : vector<2x32xf32>
    %72 = math.tanh %71 : vector<2x32xf32>
    %73 = arith.mulf %68, %72 : vector<2x32xf32>
    %74 = arith.index_cast %c1_i32 : i32 to index
    %c0_24 = arith.constant 0 : index
    %c0_25 = arith.constant 0 : index
    %75 = vector.load %arg8[%74, %c0_24, %c0_25] : memref<8x2x32xf32, #tpu.memory_space<vmem>>, vector<1x2x32xf32>
    %76 = vector.shape_cast %75 : vector<1x2x32xf32> to vector<2x32xf32>
    %77 = vector.shape_cast %73 : vector<2x32xf32> to vector<1x2x32xf32>
    tpu.vector_store %arg8[%74, %c0_24, %c0_25], %77 {strides = array<i32>} : memref<8x2x32xf32, #tpu.memory_space<vmem>>, vector<1x2x32xf32>,
    %c2_i32_26 = arith.constant 2 : i32
    %c2_i32_27 = arith.constant 2 : i32
    %78 = arith.muli %c2_i32_26, %c2_i32_27 : i32
    %79 = arith.index_cast %78 : i32 to index
    %c0_28 = arith.constant 0 : index
    %80 = vector.load %arg7[%79, %c0_28] : memref<16x128xf32, #tpu.memory_space<vmem>>, vector<2x128xf32>
    %cst_29 = arith.constant dense<0.000000e+00> : vector<2x128xf32>
    %81 = tpu.matmul %73, %7, %cst_29 {dimension_numbers = #tpu.dot_dimension_numbers<[1], [0], [0], [1], [0, 0, 1, 1], [], []>} : vector<2x32xf32>, vector<32x128xf32>, vector<2x128xf32> -> vector<2x128xf32>
    %82 = arith.addf %80, %81 : vector<2x128xf32>
    %83 = vector.extract_strided_slice %82 {offsets = [0, 0], sizes = [2, 32], strides = [1, 1]} : vector<2x128xf32> to vector<2x32xf32>
    %84 = arith.negf %83 : vector<2x32xf32>
    %85 = math.exp %84 : vector<2x32xf32>
    %cst_30 = arith.constant 1.000000e+00 : f32
    %86 = vector.broadcast %cst_30 : f32 to vector<2x32xf32>
    %87 = arith.addf %86, %85 : vector<2x32xf32>
    %88 = arith.divf %86, %87 : vector<2x32xf32>
    %89 = vector.extract_strided_slice %82 {offsets = [0, 32], sizes = [2, 32], strides = [1, 1]} : vector<2x128xf32> to vector<2x32xf32>
    %90 = arith.negf %89 : vector<2x32xf32>
    %91 = math.exp %90 : vector<2x32xf32>
    %cst_31 = arith.constant 1.000000e+00 : f32
    %92 = vector.broadcast %cst_31 : f32 to vector<2x32xf32>
    %93 = arith.addf %92, %91 : vector<2x32xf32>
    %94 = arith.divf %92, %93 : vector<2x32xf32>
    %95 = vector.extract_strided_slice %82 {offsets = [0, 64], sizes = [2, 32], strides = [1, 1]} : vector<2x128xf32> to vector<2x32xf32>
    %96 = math.tanh %95 : vector<2x32xf32>
    %97 = vector.extract_strided_slice %82 {offsets = [0, 96], sizes = [2, 32], strides = [1, 1]} : vector<2x128xf32> to vector<2x32xf32>
    %98 = arith.negf %97 : vector<2x32xf32>
    %99 = math.exp %98 : vector<2x32xf32>
    %cst_32 = arith.constant 1.000000e+00 : f32
    %100 = vector.broadcast %cst_32 : f32 to vector<2x32xf32>
    %101 = arith.addf %100, %99 : vector<2x32xf32>
    %102 = arith.divf %100, %101 : vector<2x32xf32>
    %103 = arith.mulf %94, %71 : vector<2x32xf32>
    %104 = arith.mulf %88, %96 : vector<2x32xf32>
    %105 = arith.addf %103, %104 : vector<2x32xf32>
    %106 = math.tanh %105 : vector<2x32xf32>
    %107 = arith.mulf %102, %106 : vector<2x32xf32>
    %108 = arith.index_cast %c2_i32_26 : i32 to index
    %c0_33 = arith.constant 0 : index
    %c0_34 = arith.constant 0 : index
    %109 = vector.load %arg8[%108, %c0_33, %c0_34] : memref<8x2x32xf32, #tpu.memory_space<vmem>>, vector<1x2x32xf32>
    %110 = vector.shape_cast %109 : vector<1x2x32xf32> to vector<2x32xf32>
    %111 = vector.shape_cast %107 : vector<2x32xf32> to vector<1x2x32xf32>
    tpu.vector_store %arg8[%108, %c0_33, %c0_34], %111 {strides = array<i32>} : memref<8x2x32xf32, #tpu.memory_space<vmem>>, vector<1x2x32xf32>,
    %c3_i32 = arith.constant 3 : i32
    %c2_i32_35 = arith.constant 2 : i32
    %112 = arith.muli %c3_i32, %c2_i32_35 : i32
    %113 = arith.index_cast %112 : i32 to index
    %c0_36 = arith.constant 0 : index
    %114 = vector.load %arg7[%113, %c0_36] : memref<16x128xf32, #tpu.memory_space<vmem>>, vector<2x128xf32>
    %cst_37 = arith.constant dense<0.000000e+00> : vector<2x128xf32>
    %115 = tpu.matmul %107, %7, %cst_37 {dimension_numbers = #tpu.dot_dimension_numbers<[1], [0], [0], [1], [0, 0, 1, 1], [], []>} : vector<2x32xf32>, vector<32x128xf32>, vector<2x128xf32> -> vector<2x128xf32>
    %116 = arith.addf %114, %115 : vector<2x128xf32>
    %117 = vector.extract_strided_slice %116 {offsets = [0, 0], sizes = [2, 32], strides = [1, 1]} : vector<2x128xf32> to vector<2x32xf32>
    %118 = arith.negf %117 : vector<2x32xf32>
    %119 = math.exp %118 : vector<2x32xf32>
    %cst_38 = arith.constant 1.000000e+00 : f32
    %120 = vector.broadcast %cst_38 : f32 to vector<2x32xf32>
    %121 = arith.addf %120, %119 : vector<2x32xf32>
    %122 = arith.divf %120, %121 : vector<2x32xf32>
    %123 = vector.extract_strided_slice %116 {offsets = [0, 32], sizes = [2, 32], strides = [1, 1]} : vector<2x128xf32> to vector<2x32xf32>
    %124 = arith.negf %123 : vector<2x32xf32>
    %125 = math.exp %124 : vector<2x32xf32>
    %cst_39 = arith.constant 1.000000e+00 : f32
    %126 = vector.broadcast %cst_39 : f32 to vector<2x32xf32>
    %127 = arith.addf %126, %125 : vector<2x32xf32>
    %128 = arith.divf %126, %127 : vector<2x32xf32>
    %129 = vector.extract_strided_slice %116 {offsets = [0, 64], sizes = [2, 32], strides = [1, 1]} : vector<2x128xf32> to vector<2x32xf32>
    %130 = math.tanh %129 : vector<2x32xf32>
    %131 = vector.extract_strided_slice %116 {offsets = [0, 96], sizes = [2, 32], strides = [1, 1]} : vector<2x128xf32> to vector<2x32xf32>
    %132 = arith.negf %131 : vector<2x32xf32>
    %133 = math.exp %132 : vector<2x32xf32>
    %cst_40 = arith.constant 1.000000e+00 : f32
    %134 = vector.broadcast %cst_40 : f32 to vector<2x32xf32>
    %135 = arith.addf %134, %133 : vector<2x32xf32>
    %136 = arith.divf %134, %135 : vector<2x32xf32>
    %137 = arith.mulf %128, %105 : vector<2x32xf32>
    %138 = arith.mulf %122, %130 : vector<2x32xf32>
    %139 = arith.addf %137, %138 : vector<2x32xf32>
    %140 = math.tanh %139 : vector<2x32xf32>
    %141 = arith.mulf %136, %140 : vector<2x32xf32>
    %142 = arith.index_cast %c3_i32 : i32 to index
    %c0_41 = arith.constant 0 : index
    %c0_42 = arith.constant 0 : index
    %143 = vector.load %arg8[%142, %c0_41, %c0_42] : memref<8x2x32xf32, #tpu.memory_space<vmem>>, vector<1x2x32xf32>
    %144 = vector.shape_cast %143 : vector<1x2x32xf32> to vector<2x32xf32>
    %145 = vector.shape_cast %141 : vector<2x32xf32> to vector<1x2x32xf32>
    tpu.vector_store %arg8[%142, %c0_41, %c0_42], %145 {strides = array<i32>} : memref<8x2x32xf32, #tpu.memory_space<vmem>>, vector<1x2x32xf32>,
    %c4_i32 = arith.constant 4 : i32
    %c2_i32_43 = arith.constant 2 : i32
    %146 = arith.muli %c4_i32, %c2_i32_43 : i32
    %147 = arith.index_cast %146 : i32 to index
    %c0_44 = arith.constant 0 : index
    %148 = vector.load %arg7[%147, %c0_44] : memref<16x128xf32, #tpu.memory_space<vmem>>, vector<2x128xf32>
    %cst_45 = arith.constant dense<0.000000e+00> : vector<2x128xf32>
    %149 = tpu.matmul %141, %7, %cst_45 {dimension_numbers = #tpu.dot_dimension_numbers<[1], [0], [0], [1], [0, 0, 1, 1], [], []>} : vector<2x32xf32>, vector<32x128xf32>, vector<2x128xf32> -> vector<2x128xf32>
    %150 = arith.addf %148, %149 : vector<2x128xf32>
    %151 = vector.extract_strided_slice %150 {offsets = [0, 0], sizes = [2, 32], strides = [1, 1]} : vector<2x128xf32> to vector<2x32xf32>
    %152 = arith.negf %151 : vector<2x32xf32>
    %153 = math.exp %152 : vector<2x32xf32>
    %cst_46 = arith.constant 1.000000e+00 : f32
    %154 = vector.broadcast %cst_46 : f32 to vector<2x32xf32>
    %155 = arith.addf %154, %153 : vector<2x32xf32>
    %156 = arith.divf %154, %155 : vector<2x32xf32>
    %157 = vector.extract_strided_slice %150 {offsets = [0, 32], sizes = [2, 32], strides = [1, 1]} : vector<2x128xf32> to vector<2x32xf32>
    %158 = arith.negf %157 : vector<2x32xf32>
    %159 = math.exp %158 : vector<2x32xf32>
    %cst_47 = arith.constant 1.000000e+00 : f32
    %160 = vector.broadcast %cst_47 : f32 to vector<2x32xf32>
    %161 = arith.addf %160, %159 : vector<2x32xf32>
    %162 = arith.divf %160, %161 : vector<2x32xf32>
    %163 = vector.extract_strided_slice %150 {offsets = [0, 64], sizes = [2, 32], strides = [1, 1]} : vector<2x128xf32> to vector<2x32xf32>
    %164 = math.tanh %163 : vector<2x32xf32>
    %165 = vector.extract_strided_slice %150 {offsets = [0, 96], sizes = [2, 32], strides = [1, 1]} : vector<2x128xf32> to vector<2x32xf32>
    %166 = arith.negf %165 : vector<2x32xf32>
    %167 = math.exp %166 : vector<2x32xf32>
    %cst_48 = arith.constant 1.000000e+00 : f32
    %168 = vector.broadcast %cst_48 : f32 to vector<2x32xf32>
    %169 = arith.addf %168, %167 : vector<2x32xf32>
    %170 = arith.divf %168, %169 : vector<2x32xf32>
    %171 = arith.mulf %162, %139 : vector<2x32xf32>
    %172 = arith.mulf %156, %164 : vector<2x32xf32>
    %173 = arith.addf %171, %172 : vector<2x32xf32>
    %174 = math.tanh %173 : vector<2x32xf32>
    %175 = arith.mulf %170, %174 : vector<2x32xf32>
    %176 = arith.index_cast %c4_i32 : i32 to index
    %c0_49 = arith.constant 0 : index
    %c0_50 = arith.constant 0 : index
    %177 = vector.load %arg8[%176, %c0_49, %c0_50] : memref<8x2x32xf32, #tpu.memory_space<vmem>>, vector<1x2x32xf32>
    %178 = vector.shape_cast %177 : vector<1x2x32xf32> to vector<2x32xf32>
    %179 = vector.shape_cast %175 : vector<2x32xf32> to vector<1x2x32xf32>
    tpu.vector_store %arg8[%176, %c0_49, %c0_50], %179 {strides = array<i32>} : memref<8x2x32xf32, #tpu.memory_space<vmem>>, vector<1x2x32xf32>,
    %c5_i32 = arith.constant 5 : i32
    %c2_i32_51 = arith.constant 2 : i32
    %180 = arith.muli %c5_i32, %c2_i32_51 : i32
    %181 = arith.index_cast %180 : i32 to index
    %c0_52 = arith.constant 0 : index
    %182 = vector.load %arg7[%181, %c0_52] : memref<16x128xf32, #tpu.memory_space<vmem>>, vector<2x128xf32>
    %cst_53 = arith.constant dense<0.000000e+00> : vector<2x128xf32>
    %183 = tpu.matmul %175, %7, %cst_53 {dimension_numbers = #tpu.dot_dimension_numbers<[1], [0], [0], [1], [0, 0, 1, 1], [], []>} : vector<2x32xf32>, vector<32x128xf32>, vector<2x128xf32> -> vector<2x128xf32>
    %184 = arith.addf %182, %183 : vector<2x128xf32>
    %185 = vector.extract_strided_slice %184 {offsets = [0, 0], sizes = [2, 32], strides = [1, 1]} : vector<2x128xf32> to vector<2x32xf32>
    %186 = arith.negf %185 : vector<2x32xf32>
    %187 = math.exp %186 : vector<2x32xf32>
    %cst_54 = arith.constant 1.000000e+00 : f32
    %188 = vector.broadcast %cst_54 : f32 to vector<2x32xf32>
    %189 = arith.addf %188, %187 : vector<2x32xf32>
    %190 = arith.divf %188, %189 : vector<2x32xf32>
    %191 = vector.extract_strided_slice %184 {offsets = [0, 32], sizes = [2, 32], strides = [1, 1]} : vector<2x128xf32> to vector<2x32xf32>
    %192 = arith.negf %191 : vector<2x32xf32>
    %193 = math.exp %192 : vector<2x32xf32>
    %cst_55 = arith.constant 1.000000e+00 : f32
    %194 = vector.broadcast %cst_55 : f32 to vector<2x32xf32>
    %195 = arith.addf %194, %193 : vector<2x32xf32>
    %196 = arith.divf %194, %195 : vector<2x32xf32>
    %197 = vector.extract_strided_slice %184 {offsets = [0, 64], sizes = [2, 32], strides = [1, 1]} : vector<2x128xf32> to vector<2x32xf32>
    %198 = math.tanh %197 : vector<2x32xf32>
    %199 = vector.extract_strided_slice %184 {offsets = [0, 96], sizes = [2, 32], strides = [1, 1]} : vector<2x128xf32> to vector<2x32xf32>
    %200 = arith.negf %199 : vector<2x32xf32>
    %201 = math.exp %200 : vector<2x32xf32>
    %cst_56 = arith.constant 1.000000e+00 : f32
    %202 = vector.broadcast %cst_56 : f32 to vector<2x32xf32>
    %203 = arith.addf %202, %201 : vector<2x32xf32>
    %204 = arith.divf %202, %203 : vector<2x32xf32>
    %205 = arith.mulf %196, %173 : vector<2x32xf32>
    %206 = arith.mulf %190, %198 : vector<2x32xf32>
    %207 = arith.addf %205, %206 : vector<2x32xf32>
    %208 = math.tanh %207 : vector<2x32xf32>
    %209 = arith.mulf %204, %208 : vector<2x32xf32>
    %210 = arith.index_cast %c5_i32 : i32 to index
    %c0_57 = arith.constant 0 : index
    %c0_58 = arith.constant 0 : index
    %211 = vector.load %arg8[%210, %c0_57, %c0_58] : memref<8x2x32xf32, #tpu.memory_space<vmem>>, vector<1x2x32xf32>
    %212 = vector.shape_cast %211 : vector<1x2x32xf32> to vector<2x32xf32>
    %213 = vector.shape_cast %209 : vector<2x32xf32> to vector<1x2x32xf32>
    tpu.vector_store %arg8[%210, %c0_57, %c0_58], %213 {strides = array<i32>} : memref<8x2x32xf32, #tpu.memory_space<vmem>>, vector<1x2x32xf32>,
    %c6_i32 = arith.constant 6 : i32
    %c2_i32_59 = arith.constant 2 : i32
    %214 = arith.muli %c6_i32, %c2_i32_59 : i32
    %215 = arith.index_cast %214 : i32 to index
    %c0_60 = arith.constant 0 : index
    %216 = vector.load %arg7[%215, %c0_60] : memref<16x128xf32, #tpu.memory_space<vmem>>, vector<2x128xf32>
    %cst_61 = arith.constant dense<0.000000e+00> : vector<2x128xf32>
    %217 = tpu.matmul %209, %7, %cst_61 {dimension_numbers = #tpu.dot_dimension_numbers<[1], [0], [0], [1], [0, 0, 1, 1], [], []>} : vector<2x32xf32>, vector<32x128xf32>, vector<2x128xf32> -> vector<2x128xf32>
    %218 = arith.addf %216, %217 : vector<2x128xf32>
    %219 = vector.extract_strided_slice %218 {offsets = [0, 0], sizes = [2, 32], strides = [1, 1]} : vector<2x128xf32> to vector<2x32xf32>
    %220 = arith.negf %219 : vector<2x32xf32>
    %221 = math.exp %220 : vector<2x32xf32>
    %cst_62 = arith.constant 1.000000e+00 : f32
    %222 = vector.broadcast %cst_62 : f32 to vector<2x32xf32>
    %223 = arith.addf %222, %221 : vector<2x32xf32>
    %224 = arith.divf %222, %223 : vector<2x32xf32>
    %225 = vector.extract_strided_slice %218 {offsets = [0, 32], sizes = [2, 32], strides = [1, 1]} : vector<2x128xf32> to vector<2x32xf32>
    %226 = arith.negf %225 : vector<2x32xf32>
    %227 = math.exp %226 : vector<2x32xf32>
    %cst_63 = arith.constant 1.000000e+00 : f32
    %228 = vector.broadcast %cst_63 : f32 to vector<2x32xf32>
    %229 = arith.addf %228, %227 : vector<2x32xf32>
    %230 = arith.divf %228, %229 : vector<2x32xf32>
    %231 = vector.extract_strided_slice %218 {offsets = [0, 64], sizes = [2, 32], strides = [1, 1]} : vector<2x128xf32> to vector<2x32xf32>
    %232 = math.tanh %231 : vector<2x32xf32>
    %233 = vector.extract_strided_slice %218 {offsets = [0, 96], sizes = [2, 32], strides = [1, 1]} : vector<2x128xf32> to vector<2x32xf32>
    %234 = arith.negf %233 : vector<2x32xf32>
    %235 = math.exp %234 : vector<2x32xf32>
    %cst_64 = arith.constant 1.000000e+00 : f32
    %236 = vector.broadcast %cst_64 : f32 to vector<2x32xf32>
    %237 = arith.addf %236, %235 : vector<2x32xf32>
    %238 = arith.divf %236, %237 : vector<2x32xf32>
    %239 = arith.mulf %230, %207 : vector<2x32xf32>
    %240 = arith.mulf %224, %232 : vector<2x32xf32>
    %241 = arith.addf %239, %240 : vector<2x32xf32>
    %242 = math.tanh %241 : vector<2x32xf32>
    %243 = arith.mulf %238, %242 : vector<2x32xf32>
    %244 = arith.index_cast %c6_i32 : i32 to index
    %c0_65 = arith.constant 0 : index
    %c0_66 = arith.constant 0 : index
    %245 = vector.load %arg8[%244, %c0_65, %c0_66] : memref<8x2x32xf32, #tpu.memory_space<vmem>>, vector<1x2x32xf32>
    %246 = vector.shape_cast %245 : vector<1x2x32xf32> to vector<2x32xf32>
    %247 = vector.shape_cast %243 : vector<2x32xf32> to vector<1x2x32xf32>
    tpu.vector_store %arg8[%244, %c0_65, %c0_66], %247 {strides = array<i32>} : memref<8x2x32xf32, #tpu.memory_space<vmem>>, vector<1x2x32xf32>,
    %c7_i32 = arith.constant 7 : i32
    %c2_i32_67 = arith.constant 2 : i32
    %248 = arith.muli %c7_i32, %c2_i32_67 : i32
    %249 = arith.index_cast %248 : i32 to index
    %c0_68 = arith.constant 0 : index
    %250 = vector.load %arg7[%249, %c0_68] : memref<16x128xf32, #tpu.memory_space<vmem>>, vector<2x128xf32>
    %cst_69 = arith.constant dense<0.000000e+00> : vector<2x128xf32>
    %251 = tpu.matmul %243, %7, %cst_69 {dimension_numbers = #tpu.dot_dimension_numbers<[1], [0], [0], [1], [0, 0, 1, 1], [], []>} : vector<2x32xf32>, vector<32x128xf32>, vector<2x128xf32> -> vector<2x128xf32>
    %252 = arith.addf %250, %251 : vector<2x128xf32>
    %253 = vector.extract_strided_slice %252 {offsets = [0, 0], sizes = [2, 32], strides = [1, 1]} : vector<2x128xf32> to vector<2x32xf32>
    %254 = arith.negf %253 : vector<2x32xf32>
    %255 = math.exp %254 : vector<2x32xf32>
    %cst_70 = arith.constant 1.000000e+00 : f32
    %256 = vector.broadcast %cst_70 : f32 to vector<2x32xf32>
    %257 = arith.addf %256, %255 : vector<2x32xf32>
    %258 = arith.divf %256, %257 : vector<2x32xf32>
    %259 = vector.extract_strided_slice %252 {offsets = [0, 32], sizes = [2, 32], strides = [1, 1]} : vector<2x128xf32> to vector<2x32xf32>
    %260 = arith.negf %259 : vector<2x32xf32>
    %261 = math.exp %260 : vector<2x32xf32>
    %cst_71 = arith.constant 1.000000e+00 : f32
    %262 = vector.broadcast %cst_71 : f32 to vector<2x32xf32>
    %263 = arith.addf %262, %261 : vector<2x32xf32>
    %264 = arith.divf %262, %263 : vector<2x32xf32>
    %265 = vector.extract_strided_slice %252 {offsets = [0, 64], sizes = [2, 32], strides = [1, 1]} : vector<2x128xf32> to vector<2x32xf32>
    %266 = math.tanh %265 : vector<2x32xf32>
    %267 = vector.extract_strided_slice %252 {offsets = [0, 96], sizes = [2, 32], strides = [1, 1]} : vector<2x128xf32> to vector<2x32xf32>
    %268 = arith.negf %267 : vector<2x32xf32>
    %269 = math.exp %268 : vector<2x32xf32>
    %cst_72 = arith.constant 1.000000e+00 : f32
    %270 = vector.broadcast %cst_72 : f32 to vector<2x32xf32>
    %271 = arith.addf %270, %269 : vector<2x32xf32>
    %272 = arith.divf %270, %271 : vector<2x32xf32>
    %273 = arith.mulf %264, %241 : vector<2x32xf32>
    %274 = arith.mulf %258, %266 : vector<2x32xf32>
    %275 = arith.addf %273, %274 : vector<2x32xf32>
    %276 = math.tanh %275 : vector<2x32xf32>
    %277 = arith.mulf %272, %276 : vector<2x32xf32>
    %278 = arith.index_cast %c7_i32 : i32 to index
    %c0_73 = arith.constant 0 : index
    %c0_74 = arith.constant 0 : index
    %279 = vector.load %arg8[%278, %c0_73, %c0_74] : memref<8x2x32xf32, #tpu.memory_space<vmem>>, vector<1x2x32xf32>
    %280 = vector.shape_cast %279 : vector<1x2x32xf32> to vector<2x32xf32>
    %281 = vector.shape_cast %277 : vector<2x32xf32> to vector<1x2x32xf32>
    tpu.vector_store %arg8[%278, %c0_73, %c0_74], %281 {strides = array<i32>} : memref<8x2x32xf32, #tpu.memory_space<vmem>>, vector<1x2x32xf32>,
    %c8_i32 = arith.constant 8 : i32
    %c0_75 = arith.constant 0 : index
    %c0_76 = arith.constant 0 : index
    %c0_77 = arith.constant 0 : index
    %282 = vector.load %arg8[%c0_75, %c0_76, %c0_77] : memref<8x2x32xf32, #tpu.memory_space<vmem>>, vector<8x2x32xf32>
    %283 = vector.shape_cast %282 : vector<8x2x32xf32> to vector<16x32xf32>
    %c0_78 = arith.constant 0 : index
    %c0_79 = arith.constant 0 : index
    %284 = vector.load %arg4[%c0_78, %c0_79] : memref<32x4xf32, #tpu.memory_space<vmem>>, vector<32x4xf32>
    %cst_80 = arith.constant dense<0.000000e+00> : vector<16x4xf32>
    %285 = tpu.matmul %283, %284, %cst_80 {dimension_numbers = #tpu.dot_dimension_numbers<[1], [0], [0], [1], [0, 0, 1, 1], [], []>} : vector<16x32xf32>, vector<32x4xf32>, vector<16x4xf32> -> vector<16x4xf32>
    %c0_81 = arith.constant 0 : index
    %c0_82 = arith.constant 0 : index
    %286 = vector.load %arg5[%c0_81, %c0_82] : memref<1x4xf32, #tpu.memory_space<vmem>>, vector<1x4xf32>
    %287 = vector.broadcast %286 : vector<1x4xf32> to vector<16x4xf32>
    %288 = arith.addf %285, %287 : vector<16x4xf32>
    %c0_83 = arith.constant 0 : index
    %c0_84 = arith.constant 0 : index
    %289 = vector.load %arg6[%c0_83, %c0_84] : memref<16x4xf32, #tpu.memory_space<vmem>>, vector<16x4xf32>
    tpu.vector_store %arg6[%c0_83, %c0_84], %288 {strides = array<i32>} : memref<16x4xf32, #tpu.memory_space<vmem>>, vector<16x4xf32>,
    return
  }
}

</mosaic_0001>

<bundles_post_ra>
// kernel: forecast_net_forward.1
= control target key start
LH: loop header
LB: loop body
LE: loop exit
PB: predicated region body
PF: predicated region fallthrough
CT: control target
= control target key end

     0   :  { %vm40_vm0 = vcmask 1043456   ;;  %vm33_vm1 = vcmask 31744   ;;  %v1349_v3 = vmov 0.0   ;;  %vm1350_vm2 = vmmov 0   ;;  %s1351_s10 = smov 64   ;;  %s1582_s1 = inlined_call_operand.vmem [shape: f32[4,128], index: 1, kind: input, shape index: {}]   ;;  %s1583_s0 = inlined_call_operand.vmem [shape: f32[16,4], index: 0, kind: input, shape index: {}]   ;;  %s1584_s2 = inlined_call_operand.vmem [shape: f32[32,128], index: 2, kind: input, shape index: {}]   ;;  %s1585_s3 = inlined_call_operand.vmem [shape: f32[1,128], index: 3, kind: input, shape index: {}]   ;;  %s1586_s4 = inlined_call_operand.vmem [shape: f32[32,4], index: 4, kind: input, shape index: {}]   ;;  %s1587_s5 = inlined_call_operand.vmem [shape: f32[1,4], index: 5, kind: input, shape index: {}]   ;;  %s1588_s6 = inlined_call_operand.vmem [shape: f32[16,4], index: 6, kind: output, shape index: {}]  }
   0x1   :  { %v25_v0 = vld [vmem:[%s1582_s1] sm:$0xf]  ;;  %v24_v2 = vld [vmem:[%s1583_s0 + $0x8] sm:$0xff]  ;;  %1181 = vmatprep.subr.mxu1 %v1349_v3  ;;  %1189 = vmatprep.mubr.msk.f32.mxu1 %vm1350_vm2, %v1349_v3  ;;  %v1405_v4 = vld [vmem:[%s1584_s2 + $0x18] sm:$0xff]  ;;  %vm229_vm3 = vcmask 254976   ;;  %vm126_vm4 = vcmask 261120  }
   0x2   :  { %v23_v1 = vld [vmem:[%s1583_s0] sm:$0xff]  ;;  %1176 = vmatprep.subr.msk.mxu0 %vm40_vm0, %v25_v0  ;;  %v1410_v5 = vld [vmem:[%s1584_s2 + $0x10] sm:$0xff]  ;;  %1182 = vmatpush3.msra.mxu1 %v1405_v4  ;;  %v1418_v6 = vld [vmem:[%s1584_s2 + $0x8] sm:$0xff] }
   0x3   :  { %1178 = vmatprep.mubr.msk.f32.mxu0 %vm33_vm1, %v23_v1  ;;  %1177 = vmatpush3.msk.msra.mxu0 %vm40_vm0, %v25_v0  ;;  %v1426_v7 = vld [vmem:[%s1584_s2] sm:$0xff] }
   0x4   :  { %1179 = vmatmul.mubr.msk.f32.vlgmr.msra.gmra.mxu0 %vm33_vm1, %v24_v2  ;;  %1183 = vmatprep.subr.mxu1 %v1349_v3  ;;  %v1105_v8 = vld [vmem:[%s1585_s3] ss:$0 sm:$0xff]  ;;  %s1352_s3 = smov 32  }
   0x5   :  { %1184 = vmatpush3.msra.mxu1 %v1410_v5  ;;  %1192 = vmatprep.subr.mxu0 %v1349_v3 }
   0x6   :  { %1185 = vmatprep.subr.mxu1 %v1349_v3  ;;  %1193 = vmatpush3.msra.mxu0 %v1405_v4 }
   0x7   :  { %1186 = vmatpush3.msra.mxu1 %v1418_v6  ;;  %1194 = vmatprep.subr.mxu0 %v1349_v3 }
   0x8   :  { %1187 = vmatprep.subr.mxu1 %v1349_v3  ;;  %1195 = vmatpush3.msra.mxu0 %v1410_v5 }
   0x9   :  { %1188 = vmatpush3.msra.mxu1 %v1426_v7  ;;  %1196 = vmatprep.subr.mxu0 %v1349_v3 }
   0xa   :  { %1190 = vmatmul.mubr.f32.vlgmr.msra.gmra.mxu1 %v1349_v3  ;;  %1197 = vmatpush3.msra.mxu0 %v1418_v6 }
   0xb   :  { %1198 = vmatprep.subr.mxu0 %v1349_v3  ;;  %1200 = vmatprep.mubr.msk.f32.mxu0 %vm1350_vm2, %v1349_v3 }
   0xc   :  { %1199 = vmatpush3.msra.mxu0 %v1426_v7  ;;  %1203 = vmatprep.subr.mxu1 %v1349_v3 }
   0xd   :  { %1204 = vmatpush3.msra.mxu1 %v1405_v4  ;;  %1211 = vmatprep.mubr.msk.f32.mxu1 %vm1350_vm2, %v1349_v3 }
   0xe   :  { %1205 = vmatprep.subr.mxu1 %v1349_v3  ;;  %1214 = vmatprep.subr.mxu0 %v1349_v3 }
   0xf   :  { %1206 = vmatpush3.msra.mxu1 %v1410_v5 }
  0x10   :  { %1207 = vmatprep.subr.mxu1 %v1349_v3 }
  0x11   :  { %1208 = vmatpush3.msra.mxu1 %v1418_v6 }
  0x12   :  { %1209 = vmatprep.subr.mxu1 %v1349_v3 }
  0x13   :  { %1210 = vmatpush3.msra.mxu1 %v1426_v7 }
  0x14   :  { %1225 = vmatprep.subr.mxu1 %v1349_v3 }
  0xc4   :  { %v1180_v9 = vpop.f32.mrf.mxu0 }
  0xc5   :  { %v116_v10 = vadd.f32 %v1180_v9, %v1105_v8 }
  0xc6   :  { %v110_v11 = vpop.f32.mrf.mxu0 }
  0xc7   :  { %120 = vst [vmem:[#allocation2 + $0x8] sm:$0xff] %v116_v10  ;;  %v111_v12 = vadd.f32 %v1105_v8, %v110_v11 }
  0xc9   :  { %119 = vst [vmem:[#allocation2] sm:$0xff] %v111_v12 }
  0xca   :  { %v196_v13 = vpop.f32.mrf.mxu1 }
  0xcc   :  { %v1191_v14 = vpop.f32.mrf.mxu1 }
  0xd0   :  { %v125_v15 = vld [vmem:[#allocation2] sm:$0x3]  ;;  %v231_v31 = vld [vmem:[#allocation2 + $0x2] sm:$0x3]  ;;  %v335_v49 = vld [vmem:[#allocation2 + $0x4] sm:$0x3] }
  0xd1   :  { %v200_v16 = vadd.f32 %v196_v13, %v125_v15  ;;  %v439_v8 = vld [vmem:[#allocation2 + $0x6] sm:$0x3] }
  0xd3   :  { %1285 = vtanh.f32 %v200_v16  ;;  %v1109_v18 = vmul.f32 -1.442695, %v200_v16 }
  0xd5   :  { %1287 = vpow2.f32 %v1109_v18 }
  0xe0   :  { %v1286_v17 = vpop.eup %1285 }
  0xe1   :  { %210 = vrot.lane.b32.xlu0 %v1286_v17, %s1351_s10 }
  0xe2   :  { %v1288_v19 = vpop.eup %1287 }
  0xe3   :  { %v204_v20 = vadd.f32 1.0, %v1288_v19 }
  0xe5   :  { %1289 = vrcp.f32 %v204_v20 }
  0xf2   :  { %v1290_v21 = vpop.eup %1289 }
  0xf3   :  { %v208_v24 = vmul.f32 0.0, %v1290_v21 }
 0x153   :  { %v211_v22 = vpop.permute.xlu0 %210 }
 0x154   :  { %v213_v23 = vmul.f32 %v1290_v21, %v211_v22 }
 0x156   :  { %215 = vrot.lane.b32.xlu0 %v213_v23, %s1352_s3 }
 0x1c8   :  { %v216_v25 = vpop.permute.xlu0 %215 }
 0x1c9   :  { %v218_v26 = vadd.f32 %v216_v25, %v208_v24 }
 0x1cb   :  { %1291 = vtanh.f32 %v218_v26 }
 0x1d8   :  { %v1292_v27 = vpop.eup %1291 }
 0x1d9   :  { %221 = vrot.lane.b32.xlu1 %v1292_v27, %s1351_s10 }
 0x24b   :  { %v222_v28 = vpop.permute.xlu1 %221 }
 0x24c   :  { %v224_v29 = vmul.f32 %v1290_v21, %v222_v28 }
 0x24e   :  { %226 = vrot.lane.b32.xlu1 %v224_v29, %s1352_s3 }
 0x2c0   :  { %v227_v30 = vpop.permute.xlu1 %226 }
 0x2c1   :  { %230 = vst.msk [vmem:[#allocation3] sm:$0x3] %vm229_vm3, %v227_v30  ;;  %1201 = vmatmul.mubr.msk.f32.vlgmr.msra.gmra.mxu0 %vm126_vm4, %v227_v30 }
 0x2c2   :  { %1215 = vmatpush3.msra.mxu0 %v1405_v4  ;;  %1222 = vmatprep.mubr.msk.f32.mxu0 %vm1350_vm2, %v1349_v3 }
 0x2c3   :  { %1216 = vmatprep.subr.mxu0 %v1349_v3 }
 0x2c4   :  { %1217 = vmatpush3.msra.mxu0 %v1410_v5 }
 0x2c5   :  { %1218 = vmatprep.subr.mxu0 %v1349_v3 }
 0x2c6   :  { %1219 = vmatpush3.msra.mxu0 %v1418_v6 }
 0x2c7   :  { %1220 = vmatprep.subr.mxu0 %v1349_v3 }
 0x2c8   :  { %1221 = vmatpush3.msra.mxu0 %v1426_v7 }
 0x2c9   :  { %1236 = vmatprep.subr.mxu0 %v1349_v3 }
 0x381   :  { %v300_v32 = vpop.f32.mrf.mxu0 }
 0x382   :  { %v304_v33 = vadd.f32 %v300_v32, %v231_v31 }
 0x383   :  { %v1202_v34 = vpop.f32.mrf.mxu0 }
 0x384   :  { %1293 = vtanh.f32 %v304_v33  ;;  %v1111_v36 = vmul.f32 -1.442695, %v304_v33 }
 0x386   :  { %1295 = vpow2.f32 %v1111_v36 }
 0x391   :  { %v1294_v35 = vpop.eup %1293 }
 0x392   :  { %314 = vrot.lane.b32.xlu0 %v1294_v35, %s1351_s10 }
 0x393   :  { %v1296_v37 = vpop.eup %1295 }
 0x394   :  { %v308_v38 = vadd.f32 1.0, %v1296_v37 }
 0x396   :  { %1297 = vrcp.f32 %v308_v38 }
 0x3a3   :  { %v1298_v39 = vpop.eup %1297 }
 0x3a4   :  { %v312_v42 = vmul.f32 %v1298_v39, %v218_v26  ;;  %v543_v26 = vld [vmem:[#allocation2 + $0x8] sm:$0x3] }
 0x404   :  { %v315_v40 = vpop.permute.xlu0 %314 }
 0x405   :  { %v317_v41 = vmul.f32 %v1298_v39, %v315_v40 }
 0x407   :  { %319 = vrot.lane.b32.xlu1 %v317_v41, %s1352_s3 }
 0x479   :  { %v320_v43 = vpop.permute.xlu1 %319 }
 0x47a   :  { %v322_v44 = vadd.f32 %v320_v43, %v312_v42 }
 0x47c   :  { %1299 = vtanh.f32 %v322_v44 }
 0x489   :  { %v1300_v45 = vpop.eup %1299 }
 0x48a   :  { %325 = vrot.lane.b32.xlu0 %v1300_v45, %s1351_s10 }
 0x4fc   :  { %v326_v46 = vpop.permute.xlu0 %325 }
 0x4fd   :  { %v328_v47 = vmul.f32 %v1298_v39, %v326_v46 }
 0x4ff   :  { %330 = vrot.lane.b32.xlu1 %v328_v47, %s1352_s3 }
 0x571   :  { %v331_v48 = vpop.permute.xlu1 %330 }
 0x572   :  { %334 = vst.msk [vmem:[#allocation3 + $0x2] sm:$0x3] %vm229_vm3, %v331_v48  ;;  %1212 = vmatmul.mubr.msk.f32.vlgmr.msra.gmra.mxu1 %vm126_vm4, %v331_v48 }
 0x573   :  { %1226 = vmatpush3.msra.mxu1 %v1405_v4  ;;  %1233 = vmatprep.mubr.msk.f32.mxu1 %vm1350_vm2, %v1349_v3 }
 0x574   :  { %1227 = vmatprep.subr.mxu1 %v1349_v3 }
 0x575   :  { %1228 = vmatpush3.msra.mxu1 %v1410_v5 }
 0x576   :  { %1229 = vmatprep.subr.mxu1 %v1349_v3 }
 0x577   :  { %1230 = vmatpush3.msra.mxu1 %v1418_v6 }
 0x578   :  { %1231 = vmatprep.subr.mxu1 %v1349_v3 }
 0x579   :  { %1232 = vmatpush3.msra.mxu1 %v1426_v7 }
 0x57a   :  { %1247 = vmatprep.subr.mxu1 %v1349_v3 }
 0x632   :  { %v404_v50 = vpop.f32.mrf.mxu1 }
 0x633   :  { %v408_v51 = vadd.f32 %v404_v50, %v335_v49 }
 0x634   :  { %v1213_v52 = vpop.f32.mrf.mxu1 }
 0x635   :  { %1301 = vtanh.f32 %v408_v51  ;;  %v1113_v54 = vmul.f32 -1.442695, %v408_v51 }
 0x637   :  { %1303 = vpow2.f32 %v1113_v54 }
 0x642   :  { %v1302_v53 = vpop.eup %1301 }
 0x643   :  { %418 = vrot.lane.b32.xlu0 %v1302_v53, %s1351_s10 }
 0x644   :  { %v1304_v55 = vpop.eup %1303 }
 0x645   :  { %v412_v56 = vadd.f32 1.0, %v1304_v55 }
 0x647   :  { %1305 = vrcp.f32 %v412_v56  ;;  %v1353_v56 = vmov 1983009808  }
 0x654   :  { %v1306_v57 = vpop.eup %1305 }
 0x655   :  { %v416_v60 = vmul.f32 %v1306_v57, %v322_v44  ;;  %v647_v44 = vld [vmem:[#allocation2 + $0xa] sm:$0x3] }
 0x6b5   :  { %v419_v58 = vpop.permute.xlu0 %418 }
 0x6b6   :  { %v421_v59 = vmul.f32 %v1306_v57, %v419_v58  ;;  %v991_v58 = vlaneseq }
 0x6b8   :  { %423 = vrot.lane.b32.xlu1 %v421_v59, %s1352_s3 }
 0x72a   :  { %v424_v61 = vpop.permute.xlu1 %423 }
 0x72b   :  { %v426_v62 = vadd.f32 %v424_v61, %v416_v60  ;;  %v992_v61 = vshrl.u32 %v991_v58, 7 }
 0x72d   :  { %1307 = vtanh.f32 %v426_v62 }
 0x73a   :  { %v1308_v63 = vpop.eup %1307 }
 0x73b   :  { %429 = vrot.lane.b32.xlu0 %v1308_v63, %s1351_s10 }
 0x7ad   :  { %v430_v0 = vpop.permute.xlu0 %429 }
 0x7ae   :  { %v432_v1 = vmul.f32 %v1306_v57, %v430_v0  ;;  %v989_v57 = vunpack.c.l.s4 %v1353_v56 }
 0x7b0   :  { %434 = vrot.lane.b32.xlu1 %v432_v1, %s1352_s3  ;;  %v990_v60 = vunpack.c.0.s8 %v989_v57  ;;  %v959_v1 = vld [vmem:[#allocation3] sm:$0x3]  ;;  %v1124_v57 = vld [vmem:[%s1587_s5] ss:$0 sm:$0xff] }
 0x822   :  { %v435_v2 = vpop.permute.xlu1 %434 }
 0x823   :  { %438 = vst.msk [vmem:[#allocation3 + $0x4] sm:$0x3] %vm229_vm3, %v435_v2  ;;  %1223 = vmatmul.mubr.msk.f32.vlgmr.msra.gmra.mxu0 %vm126_vm4, %v435_v2 }
 0x824   :  { %1237 = vmatpush3.msra.mxu0 %v1405_v4  ;;  %1244 = vmatprep.mubr.msk.f32.mxu0 %vm1350_vm2, %v1349_v3 }
 0x825   :  { %1238 = vmatprep.subr.mxu0 %v1349_v3 }
 0x826   :  { %1239 = vmatpush3.msra.mxu0 %v1410_v5 }
 0x827   :  { %1240 = vmatprep.subr.mxu0 %v1349_v3 }
 0x828   :  { %1241 = vmatpush3.msra.mxu0 %v1418_v6 }
 0x829   :  { %1242 = vmatprep.subr.mxu0 %v1349_v3 }
 0x82a   :  { %1243 = vmatpush3.msra.mxu0 %v1426_v7  ;;  %v961_v63 = vld [vmem:[#allocation3 + $0x4] sm:$0x3] }
 0x82b   :  { %1258 = vmatprep.subr.mxu0 %v1349_v3 }
 0x8e3   :  { %v508_v9 = vpop.f32.mrf.mxu0 }
 0x8e4   :  { %v512_v10 = vadd.f32 %v508_v9, %v439_v8  ;;  %v1538_v8 = vsub.s32 %v990_v60, %v992_v61 }
 0x8e5   :  { %v1224_v11 = vpop.f32.mrf.mxu0 }
 0x8e6   :  { %1309 = vtanh.f32 %v512_v10  ;;  %v1115_v13 = vmul.f32 -1.442695, %v512_v10 }
 0x8e8   :  { %1311 = vpow2.f32 %v1115_v13  ;;  %v751_v13 = vld [vmem:[#allocation2 + $0xc] sm:$0x3] }
 0x8f3   :  { %v1310_v12 = vpop.eup %1309 }
 0x8f4   :  { %522 = vrot.lane.b32.xlu0 %v1310_v12, %s1351_s10 }
 0x8f5   :  { %v1312_v14 = vpop.eup %1311 }
 0x8f6   :  { %v516_v15 = vadd.f32 1.0, %v1312_v14 }
 0x8f8   :  { %1313 = vrcp.f32 %v516_v15 }
 0x905   :  { %v1314_v16 = vpop.eup %1313 }
 0x906   :  { %v520_v19 = vmul.f32 %v1314_v16, %v426_v62  ;;  %v960_v62 = vld [vmem:[#allocation3 + $0x2] sm:$0x3] }
 0x907   :  { %v986_v2 = vcombine.low %v959_v1, %v960_v62 }
 0x909   :  { %v994_v10 = vrot.slane %v986_v2, %v1538_v8 }
 0x966   :  { %v523_v17 = vpop.permute.xlu0 %522 }
 0x967   :  { %v525_v18 = vmul.f32 %v1314_v16, %v523_v17 }
 0x969   :  { %527 = vrot.lane.b32.xlu1 %v525_v18, %s1352_s3 }
 0x9db   :  { %v528_v20 = vpop.permute.xlu1 %527 }
 0x9dc   :  { %v530_v21 = vadd.f32 %v528_v20, %v520_v19 }
 0x9de   :  { %1315 = vtanh.f32 %v530_v21 }
 0x9eb   :  { %v1316_v22 = vpop.eup %1315 }
 0x9ec   :  { %533 = vrot.lane.b32.xlu0 %v1316_v22, %s1351_s10 }
 0xa5e   :  { %v534_v23 = vpop.permute.xlu0 %533 }
 0xa5f   :  { %v536_v24 = vmul.f32 %v1314_v16, %v534_v23 }
 0xa61   :  { %538 = vrot.lane.b32.xlu1 %v536_v24, %s1352_s3 }
 0xad3   :  { %v539_v25 = vpop.permute.xlu1 %538 }
 0xad4   :  { %542 = vst.msk [vmem:[#allocation3 + $0x6] sm:$0x3] %vm229_vm3, %v539_v25  ;;  %1234 = vmatmul.mubr.msk.f32.vlgmr.msra.gmra.mxu1 %vm126_vm4, %v539_v25 }
 0xad5   :  { %1248 = vmatpush3.msra.mxu1 %v1405_v4  ;;  %1255 = vmatprep.mubr.msk.f32.mxu1 %vm1350_vm2, %v1349_v3 }
 0xad6   :  { %1249 = vmatprep.subr.mxu1 %v1349_v3 }
 0xad7   :  { %1250 = vmatpush3.msra.mxu1 %v1410_v5 }
 0xad8   :  { %1251 = vmatprep.subr.mxu1 %v1349_v3 }
 0xad9   :  { %1252 = vmatpush3.msra.mxu1 %v1418_v6 }
 0xada   :  { %1253 = vmatprep.subr.mxu1 %v1349_v3 }
 0xadb   :  { %1254 = vmatpush3.msra.mxu1 %v1426_v7  ;;  %v962_v59 = vld [vmem:[#allocation3 + $0x6] sm:$0x3] }
 0xadc   :  { %v987_v0 = vcombine.low %v961_v63, %v962_v59 }
 0xade   :  { %v1001_v9 = vrot.slane %v987_v0, %v1538_v8 }
 0xae0   :  { %v1002_v12 = vcombine.low %v994_v10, %v1001_v9 }
 0xb94   :  { %v612_v27 = vpop.f32.mrf.mxu1 }
 0xb95   :  { %v616_v28 = vadd.f32 %v612_v27, %v543_v26 }
 0xb96   :  { %v1235_v29 = vpop.f32.mrf.mxu1 }
 0xb97   :  { %1317 = vtanh.f32 %v616_v28  ;;  %v1117_v31 = vmul.f32 -1.442695, %v616_v28 }
 0xb99   :  { %1319 = vpow2.f32 %v1117_v31  ;;  %v855_v31 = vld [vmem:[#allocation2 + $0xe] sm:$0x3] }
 0xba4   :  { %v1318_v30 = vpop.eup %1317 }
 0xba5   :  { %626 = vrot.lane.b32.xlu0 %v1318_v30, %s1351_s10 }
 0xba6   :  { %v1320_v32 = vpop.eup %1319 }
 0xba7   :  { %v620_v33 = vadd.f32 1.0, %v1320_v32 }
 0xba9   :  { %1321 = vrcp.f32 %v620_v33 }
 0xbb6   :  { %v1322_v34 = vpop.eup %1321 }
 0xbb7   :  { %v624_v37 = vmul.f32 %v1322_v34, %v530_v21 }
 0xc17   :  { %v627_v35 = vpop.permute.xlu0 %626 }
 0xc18   :  { %v629_v36 = vmul.f32 %v1322_v34, %v627_v35 }
 0xc1a   :  { %631 = vrot.lane.b32.xlu1 %v629_v36, %s1352_s3 }
 0xc8c   :  { %v632_v38 = vpop.permute.xlu1 %631 }
 0xc8d   :  { %v634_v39 = vadd.f32 %v632_v38, %v624_v37 }
 0xc8f   :  { %1323 = vtanh.f32 %v634_v39 }
 0xc9c   :  { %v1324_v40 = vpop.eup %1323 }
 0xc9d   :  { %637 = vrot.lane.b32.xlu0 %v1324_v40, %s1351_s10 }
 0xd0f   :  { %v638_v41 = vpop.permute.xlu0 %637 }
 0xd10   :  { %v640_v42 = vmul.f32 %v1322_v34, %v638_v41 }
 0xd12   :  { %642 = vrot.lane.b32.xlu1 %v640_v42, %s1352_s3 }
 0xd84   :  { %v643_v43 = vpop.permute.xlu1 %642 }
 0xd85   :  { %646 = vst.msk [vmem:[#allocation3 + $0x8] sm:$0x3] %vm229_vm3, %v643_v43  ;;  %1245 = vmatmul.mubr.msk.f32.vlgmr.msra.gmra.mxu0 %vm126_vm4, %v643_v43 }
 0xd86   :  { %1259 = vmatpush3.msra.mxu0 %v1405_v4  ;;  %1266 = vmatprep.mubr.msk.f32.mxu0 %vm1350_vm2, %v1349_v3 }
 0xd87   :  { %1260 = vmatprep.subr.mxu0 %v1349_v3 }
 0xd88   :  { %1261 = vmatpush3.msra.mxu0 %v1410_v5 }
 0xd89   :  { %1262 = vmatprep.subr.mxu0 %v1349_v3 }
 0xd8a   :  { %1263 = vmatpush3.msra.mxu0 %v1418_v6 }
 0xd8b   :  { %1264 = vmatprep.subr.mxu0 %v1349_v3 }
 0xd8c   :  { %1265 = vmatpush3.msra.mxu0 %v1426_v7 }
 0xe45   :  { %v716_v45 = vpop.f32.mrf.mxu0 }
 0xe46   :  { %v720_v46 = vadd.f32 %v716_v45, %v647_v44 }
 0xe47   :  { %v1246_v47 = vpop.f32.mrf.mxu0 }
 0xe48   :  { %1325 = vtanh.f32 %v720_v46  ;;  %v1119_v48 = vmul.f32 -1.442695, %v720_v46  ;;  %v970_v46 = vld [vmem:[%s1586_s4 + $0x18] sm:$0xff]  ;;  %v969_v47 = vld [vmem:[%s1586_s4 + $0x10] sm:$0xff] }
 0xe49   :  { %1269 = vmatprep.subr.mxu1 %v970_v46 }
 0xe4a   :  { %1327 = vpow2.f32 %v1119_v48  ;;  %v967_v48 = vld [vmem:[%s1586_s4] sm:$0xff] }
 0xe55   :  { %v1326_v4 = vpop.eup %1325 }
 0xe56   :  { %730 = vrot.lane.b32.xlu0 %v1326_v4, %s1351_s10  ;;  %v968_v4 = vld [vmem:[%s1586_s4 + $0x8] sm:$0xff] }
 0xe57   :  { %v1328_v49 = vpop.eup %1327 }
 0xe58   :  { %v724_v5 = vadd.f32 1.0, %v1328_v49 }
 0xe5a   :  { %1329 = vrcp.f32 %v724_v5 }
 0xe67   :  { %v1330_v50 = vpop.eup %1329 }
 0xe68   :  { %v728_v3 = vmul.f32 %v1330_v50, %v634_v39 }
 0xec8   :  { %v731_v51 = vpop.permute.xlu0 %730 }
 0xec9   :  { %v733_v6 = vmul.f32 %v1330_v50, %v731_v51 }
 0xecb   :  { %735 = vrot.lane.b32.xlu1 %v733_v6, %s1352_s3  ;;  %v963_v6 = vld [vmem:[#allocation3 + $0x8] sm:$0x3] }
 0xf3d   :  { %v736_v7 = vpop.permute.xlu1 %735 }
 0xf3e   :  { %v738_v52 = vadd.f32 %v736_v7, %v728_v3 }
 0xf40   :  { %1331 = vtanh.f32 %v738_v52 }
 0xf4d   :  { %v1332_v53 = vpop.eup %1331 }
 0xf4e   :  { %741 = vrot.lane.b32.xlu0 %v1332_v53, %s1351_s10 }
 0xfc0   :  { %v742_v54 = vpop.permute.xlu0 %741 }
 0xfc1   :  { %v744_v55 = vmul.f32 %v1330_v50, %v742_v54 }
 0xfc3   :  { %746 = vrot.lane.b32.xlu1 %v744_v55, %s1352_s3 }
0x1035   :  { %v747_v11 = vpop.permute.xlu1 %746 }
0x1036   :  { %750 = vst.msk [vmem:[#allocation3 + $0xa] sm:$0x3] %vm229_vm3, %v747_v11  ;;  %1256 = vmatmul.mubr.msk.f32.vlgmr.msra.gmra.mxu1 %vm126_vm4, %v747_v11 }
0x1037   :  { %1277 = vmatprep.mubr.msk.f32.mxu1 %vm126_vm4, %v1002_v12  ;;  %1270 = vmatpush3.msra.mxu1 %v970_v46 }
0x1038   :  { %1271 = vmatprep.subr.mxu1 %v969_v47 }
0x1039   :  { %1272 = vmatpush3.msra.mxu1 %v969_v47 }
0x103a   :  { %1273 = vmatprep.subr.mxu1 %v968_v4 }
0x103b   :  { %1274 = vmatpush3.msra.mxu1 %v968_v4 }
0x103c   :  { %1275 = vmatprep.subr.mxu1 %v967_v48 }
0x103d   :  { %1276 = vmatpush3.msra.mxu1 %v967_v48  ;;  %v964_v51 = vld [vmem:[#allocation3 + $0xa] sm:$0x3] }
0x103e   :  { %v1003_v3 = vcombine.low %v963_v6, %v964_v51 }
0x1040   :  { %v1011_v54 = vrot.slane %v1003_v3, %v1538_v8 }
0x10f6   :  { %v820_v14 = vpop.f32.mrf.mxu1 }
0x10f7   :  { %v824_v15 = vadd.f32 %v820_v14, %v751_v13 }
0x10f8   :  { %v1257_v16 = vpop.f32.mrf.mxu1 }
0x10f9   :  { %1333 = vtanh.f32 %v824_v15  ;;  %v1121_v18 = vmul.f32 -1.442695, %v824_v15 }
0x10fb   :  { %1335 = vpow2.f32 %v1121_v18 }
0x1106   :  { %v1334_v17 = vpop.eup %1333 }
0x1107   :  { %834 = vrot.lane.b32.xlu0 %v1334_v17, %s1351_s10 }
0x1108   :  { %v1336_v19 = vpop.eup %1335 }
0x1109   :  { %v828_v20 = vadd.f32 1.0, %v1336_v19 }
0x110b   :  { %1337 = vrcp.f32 %v828_v20 }
0x1118   :  { %v1338_v21 = vpop.eup %1337 }
0x1119   :  { %v832_v24 = vmul.f32 %v1338_v21, %v738_v52 }
0x1179   :  { %v835_v22 = vpop.permute.xlu0 %834 }
0x117a   :  { %v837_v23 = vmul.f32 %v1338_v21, %v835_v22 }
0x117c   :  { %839 = vrot.lane.b32.xlu1 %v837_v23, %s1352_s3 }
0x11ee   :  { %v840_v25 = vpop.permute.xlu1 %839 }
0x11ef   :  { %v842_v26 = vadd.f32 %v840_v25, %v832_v24 }
0x11f1   :  { %1339 = vtanh.f32 %v842_v26 }
0x11fe   :  { %v1340_v27 = vpop.eup %1339 }
0x11ff   :  { %845 = vrot.lane.b32.xlu0 %v1340_v27, %s1351_s10 }
0x1271   :  { %v846_v28 = vpop.permute.xlu0 %845 }
0x1272   :  { %v848_v29 = vmul.f32 %v1338_v21, %v846_v28 }
0x1274   :  { %850 = vrot.lane.b32.xlu1 %v848_v29, %s1352_s3 }
0x12e6   :  { %v851_v30 = vpop.permute.xlu1 %850 }
0x12e7   :  { %854 = vst.msk [vmem:[#allocation3 + $0xc] sm:$0x3] %vm229_vm3, %v851_v30  ;;  %1267 = vmatmul.mubr.msk.f32.vlgmr.msra.gmra.mxu0 %vm126_vm4, %v851_v30 }
0x12ee   :  { %v965_v7 = vld [vmem:[#allocation3 + $0xc] sm:$0x3] }
0x13a7   :  { %v924_v32 = vpop.f32.mrf.mxu0 }
0x13a8   :  { %v928_v33 = vadd.f32 %v924_v32, %v855_v31 }
0x13a9   :  { %v1268_v34 = vpop.f32.mrf.mxu0 }
0x13aa   :  { %1341 = vtanh.f32 %v928_v33  ;;  %v1123_v36 = vmul.f32 -1.442695, %v928_v33 }
0x13ac   :  { %1343 = vpow2.f32 %v1123_v36 }
0x13b7   :  { %v1342_v35 = vpop.eup %1341 }
0x13b8   :  { %938 = vrot.lane.b32.xlu0 %v1342_v35, %s1351_s10 }
0x13b9   :  { %v1344_v37 = vpop.eup %1343 }
0x13ba   :  { %v932_v38 = vadd.f32 1.0, %v1344_v37 }
0x13bc   :  { %1345 = vrcp.f32 %v932_v38 }
0x13c9   :  { %v1346_v39 = vpop.eup %1345 }
0x13ca   :  { %v936_v42 = vmul.f32 %v1346_v39, %v842_v26 }
0x142a   :  { %v939_v40 = vpop.permute.xlu0 %938 }
0x142b   :  { %v941_v41 = vmul.f32 %v1346_v39, %v939_v40 }
0x142d   :  { %943 = vrot.lane.b32.xlu1 %v941_v41, %s1352_s3 }
0x149f   :  { %v944_v43 = vpop.permute.xlu1 %943 }
0x14a0   :  { %v946_v44 = vadd.f32 %v944_v43, %v936_v42 }
0x14a2   :  { %1347 = vtanh.f32 %v946_v44 }
0x14af   :  { %v1348_v45 = vpop.eup %1347 }
0x14b0   :  { %949 = vrot.lane.b32.xlu0 %v1348_v45, %s1351_s10 }
0x1522   :  { %v950_v49 = vpop.permute.xlu0 %949 }
0x1523   :  { %v952_v5 = vmul.f32 %v1346_v39, %v950_v49 }
0x1525   :  { %954 = vrot.lane.b32.xlu1 %v952_v5, %s1352_s3 }
0x1597   :  { %v955_v50 = vpop.permute.xlu1 %954 }
0x1598   :  { %958 = vst.msk [vmem:[#allocation3 + $0xe] sm:$0x3] %vm229_vm3, %v955_v50 }
0x159f   :  { %v966_v52 = vld [vmem:[#allocation3 + $0xe] sm:$0x3] }
0x15a0   :  { %v1004_v53 = vcombine.low %v965_v7, %v966_v52 }
0x15a2   :  { %v1018_v55 = vrot.slane %v1004_v53, %v1538_v8 }
0x15a4   :  { %v1019_v56 = vcombine.low %v1011_v54, %v1018_v55 }
0x15a6   :  { %1278 = vmatmul.mubr.msk.f32.vlgmr.msra.gmra.mxu1 %vm126_vm4, %v1019_v56 }
0x1666   :  { %v1279_v58 = vpop.f32.mrf.mxu1 }
0x1667   :  { %v1096_v59 = vadd.f32 %v1279_v58, %v1124_v57 }
0x1668   :  { %v1090_v60 = vpop.f32.mrf.mxu1 }
0x1669   :  { %1100 = vst.msk [vmem:[%s1588_s6 + $0x8] sm:$0xff] %vm33_vm1, %v1096_v59  ;;  %v1091_v61 = vadd.f32 %v1124_v57, %v1090_v60 }
0x166b   :  { %1099 = vst.msk [vmem:[%s1588_s6] sm:$0xff] %vm33_vm1, %v1091_v61 }

</bundles_post_ra>
